<compile_context>
chip_gen: v7x
topology: tpu7x:2x2x1
jax: 0.10.0
libtpu: 0.0.40
codegen_flags: <defaults>
</compile_context>

<pallas_src>
import functools

import jax
import jax.numpy as jnp
from jax.experimental import pallas as pl
from jax.experimental.pallas import tpu as pltpu

# ---- module hyperparameters ------------------------------------------------
IN_FEATURES = 32
OUT_FEATURES = 32
GRID_MIN = -2.0
GRID_MAX = 2.0
NUM_GRIDS = 8
LN_EPS = 1e-5
SPLINE_INIT_SCALE = 0.1

_GRID = [GRID_MIN + (GRID_MAX - GRID_MIN) * g / (NUM_GRIDS - 1) for g in range(NUM_GRIDS)]
_INV_DENOM = (NUM_GRIDS - 1) / (GRID_MAX - GRID_MIN)


def _round_up(a: int, b: int) -> int:
    return (a + b - 1) // b * b


def _device_supports_bf16_vector() -> bool:
    """bf16 VPU/EUP exists on v6e/v7x; v5e and older emulate (keep f32 there)."""
    try:
        kind = jax.devices()[0].device_kind.lower()
    except Exception:
        return False
    return any(tag in kind for tag in ("v6", "v7", "tpu7"))


# ---- Pallas kernel ----------------------------------------------------------
def _kan_kernel(x_ref, grid_row_ref, w_sp_ref, w_base_ref, b_base_ref,
                gamma_ref, beta_ref, o_ref, *, elementwise_bf16):
    # x_ref:        (tm, D)      input rows
    # grid_row_ref: (1, G*D)     grid*inv_denom per fused column (g-major/d-minor)
    # w_sp_ref:     (G*D, O)     flattened spline weight (g-major/d-minor)
    # w_base_ref:   (D, O)       base linear weight
    # b_base_ref:   (1, O)       base bias
    # gamma/beta:   (1, D)       LayerNorm affine, pre-scaled by inv_denom
    # o_ref:        (tm, O)
    x = x_ref[...].astype(jnp.float32)

    # LayerNorm over the feature axis (biased variance, matches torch); stats in f32.
    mean = jnp.mean(x, axis=-1, keepdims=True)
    var = jnp.mean((x - mean) ** 2, axis=-1, keepdims=True)
    xn = (x - mean) * jax.lax.rsqrt(var + LN_EPS)
    # gamma/beta already carry the 1/denom RBF scale (host-side constant fold).
    xn = xn * gamma_ref[...] + beta_ref[...]

    # Lane-dense RBF basis: tile xn G times along the lane axis (column g*D+d
    # holds xn[:, d]), subtract the per-column (pre-scaled) grid constant, one
    # exp over the whole (tm, G*D) tile. bf16 elementwise on chips with a
    # native bf16 VPU/EUP path; f32 otherwise.
    cdt = jnp.bfloat16 if elementwise_bf16 else jnp.float32
    xnc = xn.astype(cdt)
    xt = jnp.concatenate([xnc] * NUM_GRIDS, axis=-1)            # (tm, G*D)
    diff = xt - grid_row_ref[...]                               # grid_row already in cdt
    basis = jnp.exp(-(diff * diff))                             # (tm, G*D)

    # Base path: silu in f32 (cheap, D lanes only).
    silu_x = x * jax.nn.sigmoid(x)                              # (tm, D)

    # Two accumulating MXU dots with f32 accumulation; no (tm, G*D+D) concat
    # or whole-tile cast is materialized.
    wdt = w_sp_ref.dtype
    acc = jnp.dot(basis.astype(wdt), w_sp_ref[...],
                  preferred_element_type=jnp.float32)
    acc = acc + jnp.dot(silu_x.astype(wdt), w_base_ref[...],
                        preferred_element_type=jnp.float32)
    o_ref[...] = (acc + b_base_ref[...]).astype(o_ref.dtype)


# ---- wrapper ----------------------------------------------------------------
@functools.partial(jax.jit, static_argnames=("block_rows", "use_bf16", "elementwise_bf16"))
def kan_fast_forward(x, w_spline, w_base, b_base, gamma, beta, *,
                     block_rows=1024, use_bf16=True, elementwise_bf16=None):
    """x: (batch, seq, D). w_spline: (G, D, O). Returns (batch, seq, O)."""
    batch, seq, d = x.shape
    g, _, out_f = w_spline.shape
    n = batch * seq

    if elementwise_bf16 is None:
        elementwise_bf16 = bool(use_bf16) and _device_supports_bf16_vector()

    x2 = x.reshape(n, d)

    # Row tile: big enough to amortize the ~0.35 us/step grid overhead, but
    # capped so the "parallel" grid axis always has >= 4 steps (v7x has 2
    # TensorCores and this axis is the only thing sharding across them).
    tm = min(block_rows, max(8, _round_up(pl.cdiv(n, 4), 8)))
    grid_steps = pl.cdiv(n, tm)   # ragged last block masked by Pallas; no host pad

    base_dt = jnp.bfloat16 if elementwise_bf16 else jnp.float32
    w_dt = jnp.bfloat16 if use_bf16 else jnp.float32

    # Spline weight flattened g-major/d-minor (matches the in-kernel lane
    # tiling order). _INV_DENOM constant-folded into grid row and LN affine.
    w_sp_flat = w_spline.reshape(g * d, out_f).astype(w_dt)
    w_base2 = w_base.astype(w_dt)
    grid_row = (jnp.repeat(jnp.asarray(_GRID, jnp.float32), d) * _INV_DENOM)
    grid_row = grid_row.reshape(1, g * d).astype(base_dt)
    gamma2 = (gamma.astype(jnp.float32) * _INV_DENOM).reshape(1, d)
    beta2 = (beta.astype(jnp.float32) * _INV_DENOM).reshape(1, d)
    b_base2 = b_base.reshape(1, out_f).astype(jnp.float32)

    kd = g * d + d
    cost = pl.CostEstimate(
        flops=2 * n * kd * out_f,
        transcendentals=n * kd,                              # exp (G*D) + sigmoid (D) / row
        bytes_accessed=n * (d + out_f) * x.dtype.itemsize
        + (w_sp_flat.size + w_base2.size) * jnp.dtype(w_dt).itemsize,
    )

    out = pl.pallas_call(
        functools.partial(_kan_kernel, elementwise_bf16=elementwise_bf16),
        out_shape=jax.ShapeDtypeStruct((n, out_f), x.dtype),
        grid_spec=pltpu.PrefetchScalarGridSpec(
            num_scalar_prefetch=0,
            grid=(grid_steps,),
            in_specs=[
                pl.BlockSpec((tm, d), lambda i: (i, 0)),           # x rows
                pl.BlockSpec((1, g * d), lambda i: (0, 0)),        # scaled grid row const
                pl.BlockSpec((g * d, out_f), lambda i: (0, 0)),    # flattened spline W
                pl.BlockSpec((d, out_f), lambda i: (0, 0)),        # base W
                pl.BlockSpec((1, out_f), lambda i: (0, 0)),        # base b
                pl.BlockSpec((1, d), lambda i: (0, 0)),            # LN gamma (pre-scaled)
                pl.BlockSpec((1, d), lambda i: (0, 0)),            # LN beta  (pre-scaled)
            ],
            out_specs=pl.BlockSpec((tm, out_f), lambda i: (i, 0)),
        ),
        compiler_params=pltpu.CompilerParams(dimension_semantics=("parallel",)),
        cost_estimate=cost,
    )(x2, grid_row, w_sp_flat, w_base2, b_base2, gamma2, beta2)

    return out.reshape(batch, seq, out_f)


# ---- pure-JAX reference (for correctness check) ------------------------------
def kan_fast_reference(x, w_spline, w_base, b_base, gamma, beta):
    xf = x.astype(jnp.float32)
    mean = jnp.mean(xf, axis=-1, keepdims=True)
    var = jnp.mean((xf - mean) ** 2, axis=-1, keepdims=True)
    xn = (xf - mean) * jax.lax.rsqrt(var + LN_EPS)
    xn = xn * gamma + beta
    grid = jnp.asarray(_GRID, jnp.float32)
    basis = jnp.exp(-(((xn[..., None] - grid) * _INV_DENOM) ** 2))  # (..., D, G)
    # flatten (D, G) -> D*G matching PyTorch .view(..., -1); w_spline is (G, D, O)
    w_flat = jnp.transpose(w_spline, (1, 0, 2)).reshape(x.shape[-1] * NUM_GRIDS, -1)
    ret = jnp.dot(basis.reshape(*x.shape[:-1], -1), w_flat,
                  precision=jax.lax.Precision.HIGHEST)
    base = jnp.dot(xf * jax.nn.sigmoid(xf), w_base,
                   precision=jax.lax.Precision.HIGHEST) + b_base
    return (ret + base).astype(x.dtype)


def _check(x, w_spline, w_base, b_base, gamma, beta):
    ref = kan_fast_reference(x, w_spline, w_base, b_base, gamma, beta)

    # f32-matmul path: tight check against the f32 reference.
    out_f32 = kan_fast_forward(x, w_spline, w_base, b_base, gamma, beta, use_bf16=False)
    out_f32 = jax.block_until_ready(out_f32)
    assert out_f32.shape == ref.shape
    assert jnp.allclose(out_f32, ref, atol=1e-3, rtol=1e-3), \
        float(jnp.max(jnp.abs(out_f32 - ref)))

    # default path (bf16 MXU operands, bf16 elementwise on v6e/v7x): looser tol.
    out = kan_fast_forward(x, w_spline, w_base, b_base, gamma, beta)
    out = jax.block_until_ready(out)
    assert out.shape == ref.shape
    assert jnp.allclose(out, ref, atol=5e-2, rtol=5e-2), \
        float(jnp.max(jnp.abs(out - ref)))


if __name__ == "__main__":
    key = jax.random.PRNGKey(0)
    k_x, k_sp, k_wb, k_bb, k_g, k_b, k_x2 = jax.random.split(key, 7)

    # SplineLinear weight: trunc_normal(std=0.1); stored as (G, D, O).
    w_spline = (
        jax.random.truncated_normal(k_sp, -2.0, 2.0, (NUM_GRIDS, IN_FEATURES, OUT_FEATURES))
        * SPLINE_INIT_SCALE
    ).astype(jnp.float32)

    # base Linear(D, O) weight/bias (deterministic synthetic init).
    bound = 1.0 / (IN_FEATURES ** 0.5)
    w_base = jax.random.uniform(k_wb, (IN_FEATURES, OUT_FEATURES), jnp.float32, -bound, bound)
    b_base = jax.random.uniform(k_bb, (OUT_FEATURES,), jnp.float32, -bound, bound)

    # LayerNorm affine params (randomized to exercise the kernel path).
    gamma = 1.0 + 0.05 * jax.random.normal(k_g, (IN_FEATURES,), jnp.float32)
    beta = 0.05 * jax.random.normal(k_b, (IN_FEATURES,), jnp.float32)

    # Main small case: batch=2, seq=8, hidden=32.
    x = jax.random.normal(k_x, (2, 8, IN_FEATURES), jnp.float32)
    _check(x, w_spline, w_base, b_base, gamma, beta)

    # Ragged case (batch*seq not a multiple of the row tile): exercises the
    # Pallas boundary-block masking that replaced the host-side pad/slice.
    x_rag = jax.random.normal(k_x2, (3, 7, IN_FEATURES), jnp.float32)
    _check(x_rag, w_spline, w_base, b_base, gamma, beta)

    print("KERNEL_OK")
</pallas_src>

<mosaic_0001>
module attributes {stable_mosaic.version = 11 : i64} {
  func.func @_kan_kernel(%arg0: i32, %arg1: memref<8x32xf32, #tpu.memory_space<vmem>>, %arg2: memref<1x256xf32, #tpu.memory_space<vmem>>, %arg3: memref<256x32xf32, #tpu.memory_space<vmem>>, %arg4: memref<32x32xf32, #tpu.memory_space<vmem>>, %arg5: memref<1x32xf32, #tpu.memory_space<vmem>>, %arg6: memref<1x32xf32, #tpu.memory_space<vmem>>, %arg7: memref<1x32xf32, #tpu.memory_space<vmem>>, %arg8: memref<8x32xf32, #tpu.memory_space<vmem>>) attributes {dimension_semantics = [#tpu.dimension_semantics<parallel>], iteration_bounds = array<i64: 2>, scalar_prefetch = 0 : i64, scratch_operands = 0 : i64, tpu.core_type = #tpu.core_type<tc>, window_params = [{transform_indices = @transform_0, window_bounds = array<i64: 8, 32>}, {pipeline_mode = #tpu.pipeline_mode<synchronous>, transform_indices = @transform_1, window_bounds = array<i64: 1, 256>}, {pipeline_mode = #tpu.pipeline_mode<synchronous>, transform_indices = @transform_2, window_bounds = array<i64: 256, 32>}, {pipeline_mode = #tpu.pipeline_mode<synchronous>, transform_indices = @transform_3, window_bounds = array<i64: 32, 32>}, {pipeline_mode = #tpu.pipeline_mode<synchronous>, transform_indices = @transform_4, window_bounds = array<i64: 1, 32>}, {pipeline_mode = #tpu.pipeline_mode<synchronous>, transform_indices = @transform_5, window_bounds = array<i64: 1, 32>}, {pipeline_mode = #tpu.pipeline_mode<synchronous>, transform_indices = @transform_6, window_bounds = array<i64: 1, 32>}, {transform_indices = @transform_7, window_bounds = array<i64: 8, 32>}]} {
    %c0 = arith.constant 0 : index
    %c0_0 = arith.constant 0 : index
    %0 = vector.load %arg1[%c0, %c0_0] : memref<8x32xf32, #tpu.memory_space<vmem>>, vector<8x32xf32>
    %cst = arith.constant dense<0.000000e+00> : vector<8xf32>
    %1 = vector.multi_reduction <add>, %0, %cst [1] : vector<8x32xf32> to vector<8xf32>
    %2 = vector.shape_cast %1 : vector<8xf32> to vector<8x1xf32>
    %cst_1 = arith.constant 3.200000e+01 : f32
    %3 = vector.broadcast %cst_1 : f32 to vector<8x1xf32>
    %4 = arith.divf %2, %3 : vector<8x1xf32>
    %5 = vector.broadcast %4 : vector<8x1xf32> to vector<8x32xf32>
    %6 = arith.subf %0, %5 : vector<8x32xf32>
    %7 = arith.mulf %6, %6 : vector<8x32xf32>
    %cst_2 = arith.constant dense<0.000000e+00> : vector<8xf32>
    %8 = vector.multi_reduction <add>, %7, %cst_2 [1] : vector<8x32xf32> to vector<8xf32>
    %9 = vector.shape_cast %8 : vector<8xf32> to vector<8x1xf32>
    %cst_3 = arith.constant 3.200000e+01 : f32
    %10 = vector.broadcast %cst_3 : f32 to vector<8x1xf32>
    %11 = arith.divf %9, %10 : vector<8x1xf32>
    %12 = vector.broadcast %4 : vector<8x1xf32> to vector<8x32xf32>
    %13 = arith.subf %0, %12 : vector<8x32xf32>
    %cst_4 = arith.constant 9.99999974E-6 : f32
    %14 = vector.broadcast %cst_4 : f32 to vector<8x1xf32>
    %15 = arith.addf %11, %14 : vector<8x1xf32>
    %16 = math.rsqrt %15 : vector<8x1xf32>
    %17 = vector.broadcast %16 : vector<8x1xf32> to vector<8x32xf32>
    %18 = arith.mulf %13, %17 : vector<8x32xf32>
    %c0_5 = arith.constant 0 : index
    %c0_6 = arith.constant 0 : index
    %19 = vector.load %arg6[%c0_5, %c0_6] : memref<1x32xf32, #tpu.memory_space<vmem>>, vector<1x32xf32>
    %20 = vector.broadcast %19 : vector<1x32xf32> to vector<8x32xf32>
    %21 = arith.mulf %18, %20 : vector<8x32xf32>
    %c0_7 = arith.constant 0 : index
    %c0_8 = arith.constant 0 : index
    %22 = vector.load %arg7[%c0_7, %c0_8] : memref<1x32xf32, #tpu.memory_space<vmem>>, vector<1x32xf32>
    %23 = vector.broadcast %22 : vector<1x32xf32> to vector<8x32xf32>
    %24 = arith.addf %21, %23 : vector<8x32xf32>
    %25 = tpu.concatenate %24, %24, %24, %24, %24, %24, %24, %24 in 1 : vector<8x32xf32>, vector<8x32xf32>, vector<8x32xf32>, vector<8x32xf32>, vector<8x32xf32>, vector<8x32xf32>, vector<8x32xf32>, vector<8x32xf32> -> vector<8x256xf32>
    %c0_9 = arith.constant 0 : index
    %c0_10 = arith.constant 0 : index
    %26 = vector.load %arg2[%c0_9, %c0_10] : memref<1x256xf32, #tpu.memory_space<vmem>>, vector<1x256xf32>
    %27 = vector.broadcast %26 : vector<1x256xf32> to vector<8x256xf32>
    %28 = arith.subf %25, %27 : vector<8x256xf32>
    %29 = arith.mulf %28, %28 : vector<8x256xf32>
    %cst_11 = arith.constant 0.000000e+00 : f32
    %30 = vector.broadcast %cst_11 : f32 to vector<8x256xf32>
    %31 = arith.subf %30, %29 : vector<8x256xf32>
    %32 = math.exp %31 : vector<8x256xf32>
    %33 = arith.negf %0 : vector<8x32xf32>
    %34 = math.exp %33 : vector<8x32xf32>
    %cst_12 = arith.constant 1.000000e+00 : f32
    %35 = vector.broadcast %cst_12 : f32 to vector<8x32xf32>
    %36 = arith.addf %35, %34 : vector<8x32xf32>
    %37 = arith.divf %35, %36 : vector<8x32xf32>
    %38 = arith.mulf %0, %37 : vector<8x32xf32>
    %c0_13 = arith.constant 0 : index
    %c0_14 = arith.constant 0 : index
    %39 = vector.load %arg3[%c0_13, %c0_14] : memref<256x32xf32, #tpu.memory_space<vmem>>, vector<256x32xf32>
    %cst_15 = arith.constant dense<0.000000e+00> : vector<8x32xf32>
    %40 = tpu.matmul %32, %39, %cst_15 {dimension_numbers = #tpu.dot_dimension_numbers<[1], [0], [0], [1], [0, 0, 1, 1], [], []>} : vector<8x256xf32>, vector<256x32xf32>, vector<8x32xf32> -> vector<8x32xf32>
    %c0_16 = arith.constant 0 : index
    %c0_17 = arith.constant 0 : index
    %41 = vector.load %arg4[%c0_16, %c0_17] : memref<32x32xf32, #tpu.memory_space<vmem>>, vector<32x32xf32>
    %cst_18 = arith.constant dense<0.000000e+00> : vector<8x32xf32>
    %42 = tpu.matmul %38, %41, %cst_18 {dimension_numbers = #tpu.dot_dimension_numbers<[1], [0], [0], [1], [0, 0, 1, 1], [], []>} : vector<8x32xf32>, vector<32x32xf32>, vector<8x32xf32> -> vector<8x32xf32>
    %43 = arith.addf %40, %42 : vector<8x32xf32>
    %c0_19 = arith.constant 0 : index
    %c0_20 = arith.constant 0 : index
    %44 = vector.load %arg5[%c0_19, %c0_20] : memref<1x32xf32, #tpu.memory_space<vmem>>, vector<1x32xf32>
    %45 = vector.broadcast %44 : vector<1x32xf32> to vector<8x32xf32>
    %46 = arith.addf %43, %45 : vector<8x32xf32>
    %c0_21 = arith.constant 0 : index
    %c0_22 = arith.constant 0 : index
    %47 = vector.load %arg8[%c0_21, %c0_22] : memref<8x32xf32, #tpu.memory_space<vmem>>, vector<8x32xf32>
    tpu.vector_store %arg8[%c0_21, %c0_22], %46 {strides = array<i32>} : memref<8x32xf32, #tpu.memory_space<vmem>>, vector<8x32xf32>,
    return
  }
  func.func @transform_0(%arg0: i32) -> (i32, i32) {
    %c0_i32 = arith.constant 0 : i32
    %c0_i32_0 = arith.constant 0 : i32
    return %arg0, %c0_i32 : i32, i32
  }
  func.func @transform_1(%arg0: i32) -> (i32, i32) {
    %c0_i32 = arith.constant 0 : i32
    %c0_i32_0 = arith.constant 0 : i32
    %c0_i32_1 = arith.constant 0 : i32
    return %c0_i32, %c0_i32_0 : i32, i32
  }
  func.func @transform_2(%arg0: i32) -> (i32, i32) {
    %c0_i32 = arith.constant 0 : i32
    %c0_i32_0 = arith.constant 0 : i32
    %c0_i32_1 = arith.constant 0 : i32
    return %c0_i32, %c0_i32_0 : i32, i32
  }
  func.func @transform_3(%arg0: i32) -> (i32, i32) {
    %c0_i32 = arith.constant 0 : i32
    %c0_i32_0 = arith.constant 0 : i32
    %c0_i32_1 = arith.constant 0 : i32
    return %c0_i32, %c0_i32_0 : i32, i32
  }
  func.func @transform_4(%arg0: i32) -> (i32, i32) {
    %c0_i32 = arith.constant 0 : i32
    %c0_i32_0 = arith.constant 0 : i32
    %c0_i32_1 = arith.constant 0 : i32
    return %c0_i32, %c0_i32_0 : i32, i32
  }
  func.func @transform_5(%arg0: i32) -> (i32, i32) {
    %c0_i32 = arith.constant 0 : i32
    %c0_i32_0 = arith.constant 0 : i32
    %c0_i32_1 = arith.constant 0 : i32
    return %c0_i32, %c0_i32_0 : i32, i32
  }
  func.func @transform_6(%arg0: i32) -> (i32, i32) {
    %c0_i32 = arith.constant 0 : i32
    %c0_i32_0 = arith.constant 0 : i32
    %c0_i32_1 = arith.constant 0 : i32
    return %c0_i32, %c0_i32_0 : i32, i32
  }
  func.func @transform_7(%arg0: i32) -> (i32, i32) {
    %c0_i32 = arith.constant 0 : i32
    %c0_i32_0 = arith.constant 0 : i32
    return %arg0, %c0_i32 : i32, i32
  }
}

</mosaic_0001>

<bundles_post_ra>
// kernel: kan_fast_forward.1
= control target key start
LH: loop header
LB: loop body
LE: loop exit
PB: predicated region body
PF: predicated region fallthrough
CT: control target
= control target key end

     0   :  { %12 = vsyncpa [#allocation3], 0  ;;  %s1128_s0 = inlined_call_operand.vmem [shape: f32[16,32], index: 0, kind: input, shape index: {}]   ;;  %s1129_s1 = inlined_call_operand.vmem [shape: f32[1,256], index: 1, kind: input, shape index: {}]   ;;  %s1130_s2 = inlined_call_operand.hbm [shape: f32[256,32], index: 2, kind: input, shape index: {}]   ;;  %s1131_s3 = inlined_call_operand.vmem [shape: f32[32,32], index: 3, kind: input, shape index: {}]   ;;  %s1132_s4 = inlined_call_operand.vmem [shape: f32[1,32], index: 4, kind: input, shape index: {}]   ;;  %s1133_s5 = inlined_call_operand.vmem [shape: f32[1,32], index: 5, kind: input, shape index: {}]   ;;  %s1134_s6 = inlined_call_operand.vmem [shape: f32[1,32], index: 6, kind: input, shape index: {}]   ;;  %s1135_s7 = inlined_call_operand.hbm [shape: f32[16,32], index: 7, kind: output, shape index: {}]  }
   0x1   :  { %13 = vsyncpa [#allocation4], 0 }
   0x2   :  { %15 = vsyncpa [#allocation4 + $0x1], 0  ;;  %s958_s24 = smov 0   ;;  %s960_s25 = smov 0  }
   0x3   :  { %s962_s26 = smov 0   ;;  %s964_s27 = smov 0  }
   0x4 LB: > { %s979_s28 = sadd.s32 4294967295, %s906_s27   ;;  %s638_s29 = sadd.s32 4294967294, %s906_s27   ;;  %s906_s27 = sphi %s964_s27, %s1151_s27   ;;  %s902_s26 = sphi %s962_s26, %s1150_s26   ;;  %s898_s25 = sphi %s960_s25, %s1149_s25   ;;  %s894_s24 = sphi %s958_s24, %s1148_s24  }
   0x5   : > { %s983_s30 = sadd.s32 1, %s906_s27   ;;  %s180_s8 = sadd.s32 1, %s902_s26 }
   0x6   : > { %s177_s9 = ssub.s32 %s906_s27, %s983_s30  ;;  %p190_p0 = scmp.ne.s32.totalorder %s902_s26, %s898_s25 }
   0x7   : > { %p178_p1 = scmp.eq.s32.totalorder %s177_s9, 0  ;;  %p191_p2 = scmp.eq.s32.totalorder %s979_s28, 1 }
   0x8   : > { %p196_p3 = scmp.ne.s32.totalorder %s898_s25, %s894_s24  ;;  %p197_p4 = scmp.eq.s32.totalorder %s638_s29, 1 }
   0x9   : > { %s994_s10 = scalar_select %p178_p1, %s902_s26, %s180_s8  }
   0xa   : > { %p996_p5 = por %p191_p2, %p190_p0  ;;  %p1000_p6 = por %p197_p4, %p196_p3 }
   0xb   : > { %p639_p7 = scmp.ge.s32.totalorder %s906_s27, 1  ;;  %p204_p8 = scmp.lt.s32.totalorder %s906_s27, 3 }
   0xc   : > { %s1139_s11 = scalar_select %p996_p5, 1, 0 }
   0xd   : > { %s1140_s12 = scalar_select %p1000_p6, 1, 0 }
   0xe   : > { %p1136_p9 = scmp.eq.s32.totalorder %s979_s28, 0  ;;  %p1007_p10 = pnand %p639_p7, %p204_p8 }
   0xf   : > { %s908_s14 = smov [#allocation2]   ;;  %s812_s19 = scalar_lea.hbm %s1130_s2, 4096 }
  0x10   : > { %s1141_s13 = scalar_select %p1007_p10, 1, 0 }
  0x11   : > { %s219_s15 = sshll.u32 %s908_s14, 4  ;;  %p750_p11 = pneg %p1007_p10  ;;  %s220_s15 = int_to_ptr.vmem [resolvable:$true] %s219_s15 }
  0x12   : > { %p813_p13 = scmp.ne.s32.totalorder %s1130_s2, %s812_s19  ;;  %p819_p3 = scmp.lt.u32.totalorder %s812_s19, %s1130_s2 }
  0x13   : > { %p1015_p12 = pnand %p1136_p9, %p750_p11 }
  0x15   : > { %p814_p0 = pneg %p1015_p12 }
  0x17   : > { %p815_p1 = pnand %p814_p0, %p813_p13 }
  0x19   : > { %p816_p2 = pneg %p815_p1 }
  0x1b   : > { %p821_p4 = pnand %p819_p3, %p816_p2 }
  0x1d   : > { %824 = shalt.err (!%p821_p4)
}
  0x1e   : > { %s825_s29 = scalar_lea.vmem %s220_s15, 4096  ;;  %p833_p9 = scmp.lt.s32.totalorder %s220_s15, %s220_s15 }
  0x1f   : > { %p826_p7 = scmp.ne.s32.totalorder %s220_s15, %s825_s29  ;;  %p834_p6 = scmp.lt.s32.totalorder %s825_s29, %s825_s29 }
  0x21   : > { %p828_p8 = pnand %p826_p7, %p814_p0  ;;  %p835_p5 = por %p834_p6, %p833_p9 }
  0x23   : > { %p829_p11 = pneg %p828_p8 }
  0x25   : > { %p836_p10 = pnand %p835_p5, %p829_p11 }
  0x27   : > { %839 = shalt.err (!%p836_p10)
}
  0x28   : > { %s909_s8 = smov 128   ;;  %s910_s9 = smov 8  }
  0x29   : > { %753 = dma.hbm_to_vmem [thread:$0]  (!%p1015_p12), %s1130_s2, 4096, %s220_s15, [#allocation3], %s909_s8, %s909_s8, %s910_s9  }
  0x2a   : > { %p1143_p13 = scmp.ne.s32.totalorder %s1141_s13, 0 }
  0x2b   : > { %p1144_p1 = scmp.eq.s32.totalorder (!%p1143_p13), %s979_s28, 0 }
  0x2c   : > { %254 = sbr.rel (%p1143_p13) target bundleno = 747 (0x2eb), region = 48 }
  0x33   : > { %885 = dma.done.wait (%p1144_p1), [#allocation3], 4096   ;;  %p1145_p0 = pmov %p1144_p1 }
  0x34   : > { %p285_p5 = scmp.lt.s32.totalorder %s979_s28, 1  ;;  %vm290_vm0 = vcmask 261120   ;;  %v381_v7 = vld [vmem:[#allocation2 + $0x80] sm:$0xff]  ;;  %v382_v8 = vld [vmem:[#allocation2 + $0x88] sm:$0xff]  ;;  %v383_v12 = vld [vmem:[#allocation2 + $0x90] sm:$0xff]  ;;  %s911_s29 = smov 96  }
  0x35   : > { %887 = vsyncadd (%p1145_p0), [#allocation3], 4294963200  ;;  %v365_v9 = vld [vmem:[#allocation2] sm:$0xff]  ;;  %v712_v10 = vpack.c.bf16 %v382_v8, %v381_v7  ;;  %v366_v11 = vld [vmem:[#allocation2 + $0x8] sm:$0xff]  ;;  %s912_s8 = smov 32   ;;  %v913_v60 = vmov 0.0|0.0  }
  0x36   : > { %s286_s18 = scalar_select %p285_p5, %s979_s28, 1  ;;  %v384_v13 = vld [vmem:[#allocation2 + $0x98] sm:$0xff]  ;;  %v714_v14 = vpack.c.bf16 %v366_v11, %v365_v9  ;;  %v367_v16 = vld [vmem:[#allocation2 + $0x10] sm:$0xff]  ;;  %v385_v23 = vld [vmem:[#allocation2 + $0xa0] sm:$0xff]  ;;  %706 = vmatprep.subr.bf16.mxu0 %v913_v60  ;;  %vm915_vm1 = vmmov 0   ;;  %vm332_vm2 = vcmask 523264  }
  0x37   : > { %v716_v15 = vpack.c.bf16 %v384_v13, %v383_v12  ;;  %v368_v17 = vld [vmem:[#allocation2 + $0x18] sm:$0xff]  ;;  %713 = vmatprep.subr.bf16.mxu1 %v712_v10  ;;  %v386_v24 = vld [vmem:[#allocation2 + $0xa8] sm:$0xff]  ;;  %v369_v26 = vld [vmem:[#allocation2 + $0x20] sm:$0xff]  ;;  %v916_v13 = vmov 0.0   ;;  %vm334_vm3 = vcmask 785408   ;;  %s282_s23 = sand.u32 1, %s898_s25  }
  0x38   : > { %s645_s19 = sshll.u32 %s286_s18, 3  ;;  %715 = vmatpush3.bf16.msra.mxu1 %v714_v14  ;;  %v718_v18 = vpack.c.bf16 %v368_v17, %v367_v16  ;;  %v720_v25 = vpack.c.bf16 %v386_v24, %v385_v23  ;;  %v370_v27 = vld [vmem:[#allocation2 + $0x28] sm:$0xff]  ;;  %v387_v29 = vld [vmem:[#allocation2 + $0xb0] sm:$0xff]  ;;  %v388_v30 = vld [vmem:[#allocation2 + $0xb8] sm:$0xff]  ;;  %703 = vmatprep.mubr.msk.f32.mxu0 %vm915_vm1, %v916_v13  ;;  %v338_v14 = vlaneseq  ;;  %s652_s14 = sshll.u32 %s979_s28, 7 }
  0x39   : > { %s288_s21 = scalar_lea.vmem %s1128_s0, %s645_s19  ;;  %717 = vmatprep.subr.bf16.mxu1 %v716_v15  ;;  %v722_v28 = vpack.c.bf16 %v370_v27, %v369_v26  ;;  %v724_v31 = vpack.c.bf16 %v388_v30, %v387_v29  ;;  %v371_v32 = vld [vmem:[#allocation2 + $0x30] sm:$0xff]  ;;  %v372_v33 = vld [vmem:[#allocation2 + $0x38] sm:$0xff]  ;;  %v646_v36 = vld [vmem:[%s1133_s5] ss:$0 sm:$0xff]  ;;  %s914_s19 = smov 64  }
  0x3a   : > { %v1046_v0 = vld [vmem:[%s288_s21] sm:$0xff]  ;;  %v726_v34 = vpack.c.bf16 %v372_v33, %v371_v32  ;;  %v390_v40 = vld [vmem:[#allocation2 + $0xc8] sm:$0xff]  ;;  %v391_v49 = vld [vmem:[#allocation2 + $0xd0] sm:$0xff]  ;;  %v339_v15 = vshrl.u32 %v338_v14, 7  ;;  %s1085_s16 = scalar_lea.hbm %s1135_s7, %s652_s14  ;;  %s554_s21 = scalar_lea.sflag [#allocation4], %s282_s23 }
  0x3b   : > { %v291_v1 = vsel %vm290_vm0, %v1046_v0, 0.0  ;;  %v648_v21 = vmul.f32 -1.442695, %v1046_v0  ;;  %v389_v39 = vld [vmem:[#allocation2 + $0xc0] sm:$0xff]  ;;  %v374_v44 = vld [vmem:[#allocation2 + $0x48] sm:$0xff]  ;;  %v392_v50 = vld [vmem:[#allocation2 + $0xd8] sm:$0xff] }
  0x3c   : > { %292 = vadd.xlane.f32.xlu0 %v291_v1  ;;  %719 = vmatpush3.bf16.msra.mxu1 %v718_v18  ;;  %v647_v41 = vld [vmem:[%s1134_s6] ss:$0 sm:$0xff]  ;;  %v728_v42 = vpack.c.bf16 %v390_v40, %v389_v39  ;;  %v732_v51 = vpack.c.bf16 %v392_v50, %v391_v49  ;;  %v375_v52 = vld [vmem:[#allocation2 + $0x50] sm:$0xff]  ;;  %v376_v53 = vld [vmem:[#allocation2 + $0x58] sm:$0xff]  ;;  %v340_v16 = vsub.s32 0, %v339_v15  ;;  %v344_v17 = vsub.s32 1, %v339_v15 }
  0x3d   : > { %721 = vmatprep.subr.bf16.mxu1 %v720_v25  ;;  %v373_v43 = vld [vmem:[#allocation2 + $0x40] sm:$0xff]  ;;  %v734_v54 = vpack.c.bf16 %v376_v53, %v375_v52  ;;  %v394_v56 = vld [vmem:[#allocation2 + $0xe8] sm:$0xff]  ;;  %v399_v7 = vld [vmem:[%s1131_s3 + $0x10] sm:$0xff]  ;;  %p1146_p9 = scmp.ne.s32.totalorder %s1139_s11, 0  ;;  %s917_s28 = smov [#allocation5]  }
  0x3e   : > { %v730_v46 = vpack.c.bf16 %v374_v44, %v373_v43  ;;  %v393_v55 = vld [vmem:[#allocation2 + $0xe0] sm:$0xff]  ;;  %v378_v59 = vld [vmem:[#allocation2 + $0x68] sm:$0xff]  ;;  %v400_v8 = vld [vmem:[%s1131_s3 + $0x18] sm:$0xff]  ;;  %s844_s15 = sshll.u32 %s917_s28, 4  ;;  %s845_s15 = int_to_ptr.vmem [resolvable:$false] %s844_s15 }
  0x3f   : > { %v377_v57 = vld [vmem:[#allocation2 + $0x60] sm:$0xff]  ;;  %v736_v58 = vpack.c.bf16 %v394_v56, %v393_v55  ;;  %v398_v62 = vld [vmem:[%s1131_s3 + $0x8] sm:$0xff]  ;;  %v710_v9 = vpack.c.bf16 %v400_v8, %v399_v7  ;;  %s846_s22 = scalar_lea.vmem %s845_s15, 256 }
  0x40   : > { %723 = vmatpush3.bf16.msra.mxu1 %v722_v28  ;;  %v397_v61 = vld [vmem:[%s1131_s3] sm:$0xff]  ;;  %v738_v63 = vpack.c.bf16 %v378_v59, %v377_v57 }
  0x41   : > { %725 = vmatprep.subr.bf16.mxu1 %v724_v31  ;;  %v707_v1 = vpack.c.bf16 %v398_v62, %v397_v61 }
  0x43   : > { %708 = vmatpush3.bf16.msra.mxu0 %v707_v1 }
  0x44   : > { %727 = vmatpush3.bf16.msra.mxu1 %v726_v34  ;;  %709 = vmatprep.subr.bf16.mxu0 %v913_v60 }
  0x45   : > { %729 = vmatprep.subr.bf16.mxu1 %v728_v42 }
  0x47   : > { %711 = vmatpush3.bf16.msra.mxu0 %v710_v9 }
  0x48   : > { %731 = vmatpush3.bf16.msra.mxu1 %v730_v46 }
  0x49   : > { %733 = vmatprep.subr.bf16.mxu1 %v732_v51 }
  0x4c   : > { %735 = vmatpush3.bf16.msra.mxu1 %v734_v54 }
  0x4d   : > { %737 = vmatprep.subr.bf16.mxu1 %v736_v58 }
  0x50   : > { %739 = vmatpush3.bf16.msra.mxu1 %v738_v63 }
  0xc9   : > { %v293_v2 = vpop.xlane.xlu0 %292 }
  0xca   : > { %v295_v3 = vmul.f32 0.03125, %v293_v2  ;;  %v395_v2 = vld [vmem:[#allocation2 + $0xf0] sm:$0xff] }
  0xcc   : > { %v296_v4 = vsub.f32 %v1046_v0, %v295_v3  ;;  %v396_v3 = vld [vmem:[#allocation2 + $0xf8] sm:$0xff] }
  0xce   : > { %v297_v5 = vmul.f32 %v296_v4, %v296_v4 }
  0xd0   : > { %v298_v6 = vsel %vm290_vm0, %v297_v5, 0.0  ;;  %v740_v5 = vpack.c.bf16 %v396_v3, %v395_v2 }
  0xd1   : > { %299 = vadd.xlane.f32.xlu0 %v298_v6  ;;  %v380_v6 = vld [vmem:[#allocation2 + $0x78] sm:$0xff] }
  0xd2   : > { %741 = vmatprep.subr.bf16.mxu1 %v740_v5 }
 0x15e   : > { %v300_v19 = vpop.xlane.xlu0 %299 }
 0x15f   : > { %v301_v20 = vmul.f32 0.03125, %v300_v19  ;;  %v336_v19 = vld [vmem:[%s1129_s1] sm:$0x3] }
 0x161   : > { %v302_v22 = vadd.f32 1e-05, %v301_v20  ;;  %v341_v20 = vrot.slane %v336_v19, %v340_v16 }
 0x163   : > { %802 = vrsqrt.f32 %v302_v22 }
 0x164   : > { %804 = vpow2.f32 %v648_v21  ;;  %v345_v21 = vrot.slane %v336_v19, %v344_v17 }
 0x16d   : > { %v803_v35 = vpop.eup %802 }
 0x16e   : > { %v805_v37 = vpop.eup %804  ;;  %v304_v38 = vmul.f32 %v803_v35, %v296_v4  ;;  %v379_v4 = vld [vmem:[#allocation2 + $0x70] sm:$0xff] }
 0x16f   : > { %v361_v47 = vadd.f32 1.0, %v805_v37  ;;  %v742_v10 = vpack.c.bf16 %v380_v6, %v379_v4 }
 0x170   : > { %v312_v45 = vmul.f32 %v646_v36, %v304_v38 }
 0x171   : > { %806 = vrcp.f32 %v361_v47  ;;  %743 = vmatpush3.bf16.msra.mxu1 %v742_v10 }
 0x172   : > { %v320_v48 = vadd.f32 %v647_v41, %v312_v45  ;;  %v650_v41 = vld [vmem:[%s1132_s4] ss:$0 sm:$0xff] }
 0x174   : > { %328 = vrot.lane.b32.xlu0 %v320_v48, %s911_s29  ;;  %322 = vrot.lane.b32.xlu1 %v320_v48, %s912_s8  ;;  %s644_s29 = sshll.u32 %s282_s23, 3 }
 0x175   : > { %s284_s17 = scalar_lea.vmem [#allocation5], %s644_s29 }
 0x176   : > { %s567_s18 = sshll.u32 %s284_s17, 4  ;;  %s1087_s18 = int_to_ptr.vmem [resolvable:$true] %s567_s18 }
 0x177   : > { %s840_s13 = scalar_lea.vmem %s1087_s18, 128  ;;  %p847_p2 = scmp.lt.s32.totalorder %s1087_s18, %s845_s15 }
 0x178   : > { %325 = vrot.lane.b32.xlu1 %v320_v48, %s914_s19  ;;  %p841_p6 = scmp.ne.s32.totalorder %s1087_s18, %s840_s13  ;;  %p848_p3 = scmp.lt.s32.totalorder %s846_s22, %s840_s13 }
 0x17a   : > { %p842_p10 = pnand %p841_p6, %p1146_p9  ;;  %p849_p4 = por %p848_p3, %p847_p2 }
 0x17b   : > { %v807_v11 = vpop.eup %806 }
 0x17c   : > { %v364_v12 = vmul.f32 %v807_v11, %v1046_v0  ;;  %p843_p12 = pneg %p842_p10 }
 0x17e   : > { %704 = vmatmul.mubr.msk.f32.vlgmr.msra.gmra.mrb[0].mxu0 %vm290_vm0, %v364_v12  ;;  %p850_p7 = pnand %p849_p4, %p843_p12 }
 0x1e6   : > { %v323_v18 = vpop.permute.xlu1 %322  ;;  %v329_v23 = vpop.permute.xlu0 %328 }
 0x1e7   : > { %v331_v0 = vsel %vm290_vm0, %v320_v48, %v323_v18 }
 0x1ea   : > { %v326_v22 = vpop.permute.xlu1 %325 }
 0x1eb   : > { %v333_v24 = vsel %vm332_vm2, %v331_v0, %v326_v22 }
 0x1ec   : > { %v335_v25 = vsel %vm334_vm3, %v333_v24, %v329_v23 }
 0x1ed   : > { %v348_v26 = vsub.f32 %v335_v25, %v341_v20  ;;  %v349_v27 = vsub.f32 %v335_v25, %v345_v21 }
 0x1ef   : > { %v350_v28 = vmul.f32 %v348_v26, %v348_v26  ;;  %v351_v29 = vmul.f32 %v349_v27, %v349_v27 }
 0x1f1   : > { %v352_v30 = vsub.f32 0.0, %v350_v28  ;;  %v353_v31 = vsub.f32 0.0, %v351_v29 }
 0x1f3   : > { %v354_v32 = vmul.f32 1.442695, %v352_v30  ;;  %v356_v33 = vmul.f32 1.442695, %v353_v31 }
 0x1f5   : > { %808 = vpow2.f32 %v354_v32 }
 0x1f6   : > { %810 = vpow2.f32 %v356_v33 }
 0x1ff   : > { %v809_v34 = vpop.eup %808 }
 0x200   : > { %v811_v35 = vpop.eup %810 }
 0x201   : > { %538 = vmatprep.mubr.f32.mxu1 %v811_v35 }
 0x202   : > { %539 = vmatmul.mubr.f32.vlgmr.msra.gmra.mrb[0].mxu1 %v809_v34 }
 0x251   : > { %v470_v36 = vpop.f32.mrb[0].mxu0 }
 0x252   : > { %v705_v37 = vpop.f32.mrb[1].mxu0 }
 0x2d5   : > { %v692_v38 = vpop.f32.mrb[0].mxu1 }
 0x2d6   : > { %v693_v39 = vpop.f32.mrb[1].mxu1 }
 0x2d7   : > { %v694_v40 = vadd.f32 %v693_v39, %v692_v38 }
 0x2d9   : > { %v541_v42 = vadd.f32 %v694_v40, %v470_v36 }
 0x2db   : > { %v551_v43 = vadd.f32 %v650_v41, %v541_v42 }
 0x2dd   : > { %552 = vst.msk [vmem:[%s284_s17] sm:$0xff] %vm290_vm0, %v551_v43 }
 0x2de   : > { %853 = shalt.err (!%p850_p7)
}
 0x2df   : > { %s854_s23 = scalar_lea.hbm %s1085_s16, 128  ;;  %s858_s9 = scalar_lea.hbm %s1135_s7, 256 }
 0x2e0   : > { %p855_p8 = scmp.ne.s32.totalorder %s1085_s16, %s854_s23  ;;  %p859_p1 = scmp.lt.u32.totalorder %s1085_s16, %s1135_s7 }
 0x2e1   : > { %p860_p0 = scmp.lt.u32.totalorder %s858_s9, %s854_s23  ;;  %p862_p6 = scmp.lt.u32.totalorder %s854_s23, %s1085_s16 }
 0x2e2   : > { %p856_p11 = pnand %p855_p8, %p1146_p9 }
 0x2e3   : > { %p861_p5 = por %p860_p0, %p859_p1 }
 0x2e4   : > { %p857_p13 = pneg %p856_p11 }
 0x2e5   : > { %p863_p10 = por %p862_p6, %p861_p5 }
 0x2e7   : > { %p864_p12 = pnand %p863_p10, %p857_p13 }
 0x2e9   : > { %867 = shalt.err (!%p864_p12)
}
 0x2ea   : > { %748 = dma.vmem_to_hbm [thread:$0]  (%p1146_p9), %s1087_s18, 128, %s1085_s16, %s554_s21  }
 0x2eb PF: > { %p760_p2 = scmp.ge.s32.totalorder %s906_s27, 2  ;;  %s579_s19 = sand.u32 1, %s894_s24  }
 0x2ec   : > { %p1147_p3 = scmp.ne.s32.totalorder %s1140_s12, 0  ;;  %s580_s20 = scalar_lea.sflag [#allocation4], %s579_s19 }
 0x2ee   : > { %p755_p4 = pnand %p760_p2, %p1147_p3 }
 0x2f0   : > { %889 = dma.done.wait (!%p755_p4), %s580_s20, 128  }
 0x2f1   : > { %891 = vsyncadd (!%p755_p4), %s580_s20, 4294967168  ;;  %p18_p7 = scmp.ge.s32.totalorder %s983_s30, 4   ;;  %s1148_s24 = smov %s898_s25 }
 0x2f2   : > { %s1149_s25 = smov %s902_s26  ;;  %s1150_s26 = smov %s994_s10 }
 0x2f3   : > { %s1151_s27 = smov %s983_s30  ;;  %20 = sbr.rel (!%p18_p7) target bundleno = 4 (0x4), region = 88 }
 0x2fa   :  { %585 = vsyncpa [#allocation3], 1 }
 0x2fb   :  { %587 = vsyncpa [#allocation3 + $0x1], 1 }
 0x2fc   :  { %588 = vsyncpa [#allocation4], 1 }
 0x2fd   :  { %590 = vsyncpa [#allocation4 + $0x1], 1 }

</bundles_post_ra>
